<compile_context>
chip_gen: v5e
topology: v5e:2x2
jax: 0.10.0
libtpu: 0.0.40
codegen_flags: <defaults>
</compile_context>

<pallas_src>
import jax
import jax.numpy as jnp
from jax import lax
from jax.experimental import pallas as pl
from jax.experimental.pallas import tpu as pltpu


def _round_up(x, m):
    return (x + m - 1) // m * m


def _compiler_params(semantics, vmem_bytes):
    # Explicit scoped-VMEM limit: generous margin over the block estimate but
    # kept inside v7x's 64 MiB physical VMEM (v5e/v6e have 128 MiB).
    limit = int(vmem_bytes * 1.5) + (4 << 20)
    limit = max(limit, 32 << 20)
    limit = min(limit, 56 << 20)
    return pltpu.CompilerParams(dimension_semantics=semantics,
                                vmem_limit_bytes=limit)


# ---------------------------------------------------------------------------
# FUSED kernel: projections + scores for one (batch, query-tile) block.
#   x_ref  : (S_pad, H)   compute dtype — full padded sequence of batch b
#   wq_ref : (H, H)       compute dtype (transposed, head-scaled)
#   bq_ref : (1, H)       f32           (head-scaled)
#   wk_ref : (H, H)       compute dtype (transposed, head-scaled)
#   bk_ref : (1, H)       f32           (head-scaled)
#   dep_ref: (1, S_pad)   f32 = sum(w_head)*(-1e4*(1-mask)) + b_head
#   out_ref: (TQ, S_pad)  out dtype (lane-dense)
#   k_scr  : (S_pad, H)   VMEM scratch — K for batch b, reused across qi
# ---------------------------------------------------------------------------
def _fused_kernel(x_ref, wq_ref, bq_ref, wk_ref, bk_ref, dep_ref,
                  out_ref, k_scr):
    qi = pl.program_id(1)

    # K for the whole sequence once per batch (qi axis is "arbitrary" so the
    # qi==0 step always runs first on the executing core).
    @pl.when(qi == 0)
    def _():
        k = jnp.dot(x_ref[...], wk_ref[...],
                    preferred_element_type=jnp.float32) + bk_ref[...]
        k_scr[...] = k.astype(k_scr.dtype)

    tq = out_ref.shape[0]
    row0 = pl.multiple_of(qi * tq, 128)
    xq = x_ref[pl.ds(row0, tq), :]
    q = jnp.dot(xq, wq_ref[...], preferred_element_type=jnp.float32) + bq_ref[...]

    # Contract last dims of both operands: no explicit k.T / XLU transpose.
    scores = lax.dot_general(
        q.astype(k_scr.dtype), k_scr[...],
        dimension_numbers=(((1,), (1,)), ((), ())),
        preferred_element_type=jnp.float32)
    out_ref[...] = (scores + dep_ref[...]).astype(out_ref.dtype)


# ---------------------------------------------------------------------------
# TWO-KERNEL path, kernel 1: batched Q/K projections over all padded rows.
# ---------------------------------------------------------------------------
def _proj_kernel(x_ref, wq_ref, bq_ref, wk_ref, bk_ref, qw_ref, k_ref):
    x = x_ref[...]
    q = jnp.dot(x, wq_ref[...], preferred_element_type=jnp.float32) + bq_ref[...]
    k = jnp.dot(x, wk_ref[...], preferred_element_type=jnp.float32) + bk_ref[...]
    qw_ref[...] = q.astype(qw_ref.dtype)
    k_ref[...] = k.astype(k_ref.dtype)


# ---------------------------------------------------------------------------
# TWO-KERNEL path, kernel 2: scores for one (batch, query-tile, key-tile).
# ---------------------------------------------------------------------------
def _scores_kernel(qw_ref, k_ref, dep_ref, out_ref):
    scores = lax.dot_general(
        qw_ref[...], k_ref[...],
        dimension_numbers=(((1,), (1,)), ((), ())),
        preferred_element_type=jnp.float32)
    out_ref[...] = (scores + dep_ref[...]).astype(out_ref.dtype)


def logits_self_attention(hidden_states, attention_mask, params,
                          compute_dtype=jnp.bfloat16,
                          out_dtype=jnp.float32,
                          return_padded=False,
                          fuse=None):
    """hidden_states: (B,S,H) f32, attention_mask: (B,S) f32 or None.

    Returns (B,S,S) scores in `out_dtype` (or (B,S_pad,S_pad) if
    return_padded=True — padding rows/cols must then be masked by the caller).
    """
    wq, bq, wk, bk, w_head, b_head = params
    B, S, H = hidden_states.shape
    num_heads = w_head.shape[0]
    head_size = H // num_heads

    cd_bytes = jnp.dtype(compute_dtype).itemsize
    ob_bytes = jnp.dtype(out_dtype).itemsize

    # ---- fold the Linear(num_heads, 1) weights into the projections ----
    # Balanced split keeps bf16 dynamic range sane:
    #   sum_h w_h (Q_h . K_h) = (Q * rep(sign(w)sqrt|w|)) . (K * rep(sqrt|w|))
    wh = w_head.astype(jnp.float32)
    sq_rep = jnp.repeat(jnp.sign(wh) * jnp.sqrt(jnp.abs(wh)),
                        head_size).reshape(1, H)
    sk_rep = jnp.repeat(jnp.sqrt(jnp.abs(wh)), head_size).reshape(1, H)
    wq_s = wq.T.astype(jnp.float32) * sq_rep
    bq_s = bq.astype(jnp.float32).reshape(1, H) * sq_rep
    wk_s = wk.T.astype(jnp.float32) * sk_rep
    bk_s = bk.astype(jnp.float32).reshape(1, H) * sk_rep
    wq_cd = wq_s.astype(compute_dtype)
    wk_cd = wk_s.astype(compute_dtype)

    # ---- pad sequence to a multiple of 128 (lane-dense stores) ----
    S_pad = _round_up(S, 128)
    x_pad = jnp.pad(hidden_states.astype(jnp.float32),
                    ((0, 0), (0, S_pad - S), (0, 0))).astype(compute_dtype)

    if attention_mask is None:
        mask = jnp.ones((B, S), jnp.float32)
    else:
        mask = attention_mask.astype(jnp.float32)
    mask_pad = jnp.pad(mask, ((0, 0), (0, S_pad - S)))
    wsum = jnp.sum(wh)
    dep = (wsum * (-10000.0) * (1.0 - mask_pad)
           + jnp.asarray(b_head, jnp.float32)).reshape(B, 1, S_pad)

    # ---- path selection: fuse when per-batch x + K-scratch fit VMEM ----
    fused_resident = (2 * S_pad * H * cd_bytes       # x block (double-buffered)
                      + S_pad * H * cd_bytes         # K scratch
                      + 2 * H * H * cd_bytes         # Wq + Wk (single-buffered)
                      + 2 * 128 * S_pad * ob_bytes)  # minimal out block
    if fuse is None:
        fuse = fused_resident <= (12 << 20)

    if fuse:
        # Query tile: large tiles amortize the ~0.35us/step overhead, bounded
        # by VMEM; keep >=2 parallel blocks for the two v7x TensorCores.
        tq = 128
        for cand in (512, 256, 128):
            if S_pad % cand == 0 and 2 * cand * S_pad * ob_bytes <= (16 << 20):
                tq = cand
                break
        while B * (S_pad // tq) < 2 and tq > 128:
            tq //= 2
        nq = S_pad // tq

        vmem_est = (2 * S_pad * H * cd_bytes + S_pad * H * cd_bytes
                    + 2 * H * H * cd_bytes + 4 * H * 4
                    + 2 * S_pad * 4 + 2 * tq * S_pad * ob_bytes)
        flops = 4 * B * S_pad * H * H + 2 * B * S_pad * S_pad * H
        bytes_acc = (B * S_pad * H * cd_bytes + 2 * H * H * cd_bytes
                     + B * S_pad * 4 + B * S_pad * S_pad * ob_bytes)

        out_pad = pl.pallas_call(
            _fused_kernel,
            out_shape=jax.ShapeDtypeStruct((B, S_pad, S_pad), out_dtype),
            grid=(B, nq),
            in_specs=[
                pl.BlockSpec((pl.Squeezed(), S_pad, H), lambda b, qi: (b, 0, 0)),
                pl.BlockSpec((H, H), lambda b, qi: (0, 0),
                             pipeline_mode=pl.Buffered(buffer_count=1)),
                pl.BlockSpec((1, H), lambda b, qi: (0, 0),
                             pipeline_mode=pl.Buffered(buffer_count=1)),
                pl.BlockSpec((H, H), lambda b, qi: (0, 0),
                             pipeline_mode=pl.Buffered(buffer_count=1)),
                pl.BlockSpec((1, H), lambda b, qi: (0, 0),
                             pipeline_mode=pl.Buffered(buffer_count=1)),
                pl.BlockSpec((pl.Squeezed(), 1, S_pad), lambda b, qi: (b, 0, 0)),
            ],
            out_specs=pl.BlockSpec((pl.Squeezed(), tq, S_pad),
                                   lambda b, qi: (b, qi, 0)),
            scratch_shapes=[pltpu.VMEM((S_pad, H), compute_dtype)],
            compiler_params=_compiler_params(("parallel", "arbitrary"), vmem_est),
            cost_estimate=pl.CostEstimate(flops=int(flops), transcendentals=0,
                                          bytes_accessed=int(bytes_acc)),
        )(x_pad, wq_cd, bq_s, wk_cd, bk_s, dep)

    else:
        # ---- kernel 1: projections over all B*S_pad rows ----
        rows = B * S_pad
        x_flat = x_pad.reshape(rows, H)

        tr = 128
        for cand in (4096, 2048, 1024, 512, 256, 128):
            if rows % cand == 0 and 6 * cand * H * cd_bytes <= (24 << 20):
                tr = cand
                break
        vmem1 = 6 * tr * H * cd_bytes + 2 * H * H * cd_bytes + (1 << 20)
        flops1 = 4 * rows * H * H
        bytes1 = 3 * rows * H * cd_bytes + 2 * H * H * cd_bytes

        qw_flat, k_flat = pl.pallas_call(
            _proj_kernel,
            out_shape=(jax.ShapeDtypeStruct((rows, H), compute_dtype),
                       jax.ShapeDtypeStruct((rows, H), compute_dtype)),
            grid=(rows // tr,),
            in_specs=[
                pl.BlockSpec((tr, H), lambda r: (r, 0)),
                pl.BlockSpec((H, H), lambda r: (0, 0),
                             pipeline_mode=pl.Buffered(buffer_count=1)),
                pl.BlockSpec((1, H), lambda r: (0, 0),
                             pipeline_mode=pl.Buffered(buffer_count=1)),
                pl.BlockSpec((H, H), lambda r: (0, 0),
                             pipeline_mode=pl.Buffered(buffer_count=1)),
                pl.BlockSpec((1, H), lambda r: (0, 0),
                             pipeline_mode=pl.Buffered(buffer_count=1)),
            ],
            out_specs=(pl.BlockSpec((tr, H), lambda r: (r, 0)),
                       pl.BlockSpec((tr, H), lambda r: (r, 0))),
            compiler_params=_compiler_params(("parallel",), vmem1),
            cost_estimate=pl.CostEstimate(flops=int(flops1), transcendentals=0,
                                          bytes_accessed=int(bytes1)),
        )(x_flat, wq_cd, bq_s, wk_cd, bk_s)

        qw3 = qw_flat.reshape(B, S_pad, H)
        k3 = k_flat.reshape(B, S_pad, H)

        # ---- kernel 2: scores tiled over (batch, query tile, key tile) ----
        # Key tiling bounds VMEM independent of S (v7x 64 MiB); TK as large as
        # the budget allows to minimize K re-reads.
        tk = 128
        for cand in (8192, 4096, 2048, 1024, 512, 256, 128):
            if S_pad % cand == 0 and 2 * cand * H * cd_bytes <= (12 << 20):
                tk = cand
                break
        tq = 128
        for cand in (512, 256, 128):
            if (S_pad % cand == 0
                    and 2 * cand * (tk * ob_bytes + H * cd_bytes) <= (16 << 20)):
                tq = cand
                break
        while B * (S_pad // tq) * (S_pad // tk) < 2 and tq > 128:
            tq //= 2
        nq, nk = S_pad // tq, S_pad // tk

        vmem2 = (2 * tq * H * cd_bytes + 2 * tk * H * cd_bytes
                 + 2 * tk * 4 + 2 * tq * tk * ob_bytes)
        flops2 = 2 * B * S_pad * S_pad * H
        bytes2 = (B * S_pad * H * cd_bytes + B * nq * S_pad * H * cd_bytes
                  + B * S_pad * 4 + B * S_pad * S_pad * ob_bytes)

        out_pad = pl.pallas_call(
            _scores_kernel,
            out_shape=jax.ShapeDtypeStruct((B, S_pad, S_pad), out_dtype),
            grid=(B, nq, nk),
            in_specs=[
                pl.BlockSpec((pl.Squeezed(), tq, H), lambda b, qi, kj: (b, qi, 0)),
                pl.BlockSpec((pl.Squeezed(), tk, H), lambda b, qi, kj: (b, kj, 0)),
                pl.BlockSpec((pl.Squeezed(), 1, tk), lambda b, qi, kj: (b, 0, kj)),
            ],
            out_specs=pl.BlockSpec((pl.Squeezed(), tq, tk),
                                   lambda b, qi, kj: (b, qi, kj)),
            compiler_params=_compiler_params(
                ("parallel", "parallel", "parallel"), vmem2),
            cost_estimate=pl.CostEstimate(flops=int(flops2), transcendentals=0,
                                          bytes_accessed=int(bytes2)),
        )(qw3, k3, dep)

    if return_padded:
        # Caller must mask/ignore rows & cols >= S (they hold bias-only Q.K
        # products plus the mask term — NOT guaranteed large-negative).
        return out_pad
    if S_pad == S:
        return out_pad          # no slice copy when S is already lane-dense
    # Unpad for exact module semantics (extra HBM copy; prefer S % 128 == 0 or
    # return_padded=True in perf-critical consumers).
    return out_pad[:, :S, :S]


def reference(hidden_states, attention_mask, params, num_heads):
    wq, bq, wk, bk, w_head, b_head = params
    B, S, H = hidden_states.shape
    hs = H // num_heads
    q = hidden_states @ wq.T + bq
    k = hidden_states @ wk.T + bk
    qh = q.reshape(B, S, num_heads, hs).transpose(0, 2, 1, 3)
    kh = k.reshape(B, S, num_heads, hs).transpose(0, 2, 1, 3)
    scores = jnp.einsum('bhqd,bhkd->bhqk', qh, kh)
    if attention_mask is not None:
        scores = scores + (-10000.0 * (1.0 - attention_mask))[:, None, None, :]
    scores = scores.transpose(0, 2, 3, 1)              # (B, S, S, heads)
    return scores @ w_head + b_head                    # (B, S, S)


if __name__ == "__main__":
    # Small config consistent with the module: hidden=32, heads=4, head_size=8.
    B, S, H, NUM_HEADS = 2, 8, 32, 4

    key = jax.random.PRNGKey(0)
    ks = jax.random.split(key, 8)
    hidden_states = jax.random.normal(ks[0], (B, S, H), dtype=jnp.float32)
    attention_mask = jnp.concatenate(
        [jnp.ones((B, S - 2), jnp.float32), jnp.zeros((B, 2), jnp.float32)], axis=1)

    # PyTorch Linear conventions: W is (out, in).
    wq = 0.02 * jax.random.normal(ks[1], (H, H), dtype=jnp.float32)
    bq = 0.02 * jax.random.normal(ks[2], (H,), dtype=jnp.float32)
    wk = 0.02 * jax.random.normal(ks[3], (H, H), dtype=jnp.float32)
    bk = 0.02 * jax.random.normal(ks[4], (H,), dtype=jnp.float32)
    w_head = 0.1 * jax.random.normal(ks[5], (NUM_HEADS,), dtype=jnp.float32)
    b_head = 0.1 * jax.random.normal(ks[6], (), dtype=jnp.float32)
    params = (wq, bq, wk, bk, w_head, b_head)

    ref = reference(hidden_states, attention_mask, params, NUM_HEADS)

    # 1) Fused path, f32 MXU inputs: tight match vs the f32 reference.
    out_f32 = jax.block_until_ready(logits_self_attention(
        hidden_states, attention_mask, params,
        compute_dtype=jnp.float32, out_dtype=jnp.float32))
    assert out_f32.shape == (B, S, S), out_f32.shape
    assert jnp.allclose(out_f32, ref, atol=1e-3, rtol=1e-3), \
        float(jnp.max(jnp.abs(out_f32 - ref)))

    # 2) Fused path, bf16 MXU inputs / f32 accumulate (perf default on all gens).
    out_bf16 = jax.block_until_ready(logits_self_attention(
        hidden_states, attention_mask, params,
        compute_dtype=jnp.bfloat16, out_dtype=jnp.float32))
    assert out_bf16.shape == (B, S, S), out_bf16.shape
    assert jnp.allclose(out_bf16, ref, atol=5e-2, rtol=2e-2), \
        float(jnp.max(jnp.abs(out_bf16 - ref)))

    # 3) Two-kernel (large-shape) path, bf16 scores output (halves HBM writeback).
    out_2k = jax.block_until_ready(logits_self_attention(
        hidden_states, attention_mask, params,
        compute_dtype=jnp.bfloat16, out_dtype=jnp.bfloat16, fuse=False))
    assert out_2k.shape == (B, S, S), out_2k.shape
    assert out_2k.dtype == jnp.bfloat16
    assert jnp.allclose(out_2k.astype(jnp.float32), ref, atol=5e-2, rtol=2e-2), \
        float(jnp.max(jnp.abs(out_2k.astype(jnp.float32) - ref)))

    print("KERNEL_OK")
</pallas_src>

<mosaic_0001>
module attributes {stable_mosaic.version = 11 : i64} {
  func.func @_fused_kernel(%arg0: i32, %arg1: i32, %arg2: memref<1x128x32xf32, #tpu.memory_space<vmem>>, %arg3: memref<32x32xf32, #tpu.memory_space<vmem>>, %arg4: memref<1x32xf32, #tpu.memory_space<vmem>>, %arg5: memref<32x32xf32, #tpu.memory_space<vmem>>, %arg6: memref<1x32xf32, #tpu.memory_space<vmem>>, %arg7: memref<1x1x128xf32, #tpu.memory_space<vmem>>, %arg8: memref<1x128x128xf32, #tpu.memory_space<vmem>>, %arg9: memref<128x32xf32, #tpu.memory_space<vmem>>) attributes {dimension_semantics = [#tpu.dimension_semantics<parallel>, #tpu.dimension_semantics<arbitrary>], iteration_bounds = array<i64: 2, 1>, scalar_prefetch = 0 : i64, scratch_operands = 1 : i64, tpu.core_type = #tpu.core_type<tc>, window_params = [{transform_indices = @transform_0, window_bounds = array<i64: 1, 128, 32>}, {pipeline_mode = #tpu.pipeline_mode<synchronous>, transform_indices = @transform_1, window_bounds = array<i64: 32, 32>}, {pipeline_mode = #tpu.pipeline_mode<synchronous>, transform_indices = @transform_2, window_bounds = array<i64: 1, 32>}, {pipeline_mode = #tpu.pipeline_mode<synchronous>, transform_indices = @transform_3, window_bounds = array<i64: 32, 32>}, {pipeline_mode = #tpu.pipeline_mode<synchronous>, transform_indices = @transform_4, window_bounds = array<i64: 1, 32>}, {transform_indices = @transform_5, window_bounds = array<i64: 1, 1, 128>}, {transform_indices = @transform_6, window_bounds = array<i64: 1, 128, 128>}]} {
    %c0_i32 = arith.constant 0 : i32
    %0 = arith.cmpi eq, %arg1, %c0_i32 : i32
    %1 = arith.extui %0 : i1 to i32
    %c0_i32_0 = arith.constant 0 : i32
    %2 = arith.cmpi ne, %1, %c0_i32_0 : i32
    scf.if %2 {
      %c0_15 = arith.constant 0 : index
      %c0_16 = arith.constant 0 : index
      %c0_17 = arith.constant 0 : index
      %22 = vector.load %arg2[%c0_15, %c0_16, %c0_17] : memref<1x128x32xf32, #tpu.memory_space<vmem>>, vector<1x128x32xf32>
      %23 = vector.shape_cast %22 : vector<1x128x32xf32> to vector<128x32xf32>
      %c0_18 = arith.constant 0 : index
      %c0_19 = arith.constant 0 : index
      %24 = vector.load %arg5[%c0_18, %c0_19] : memref<32x32xf32, #tpu.memory_space<vmem>>, vector<32x32xf32>
      %cst_20 = arith.constant dense<0.000000e+00> : vector<128x32xf32>
      %25 = tpu.matmul %23, %24, %cst_20 {dimension_numbers = #tpu.dot_dimension_numbers<[1], [0], [0], [1], [0, 0, 1, 1], [], []>} : vector<128x32xf32>, vector<32x32xf32>, vector<128x32xf32> -> vector<128x32xf32>
      %c0_21 = arith.constant 0 : index
      %c0_22 = arith.constant 0 : index
      %26 = vector.load %arg6[%c0_21, %c0_22] : memref<1x32xf32, #tpu.memory_space<vmem>>, vector<1x32xf32>
      %27 = vector.broadcast %26 : vector<1x32xf32> to vector<128x32xf32>
      %28 = arith.addf %25, %27 : vector<128x32xf32>
      %c0_23 = arith.constant 0 : index
      %c0_24 = arith.constant 0 : index
      %29 = vector.load %arg9[%c0_23, %c0_24] : memref<128x32xf32, #tpu.memory_space<vmem>>, vector<128x32xf32>
      tpu.vector_store %arg9[%c0_23, %c0_24], %28 {strides = array<i32>} : memref<128x32xf32, #tpu.memory_space<vmem>>, vector<128x32xf32>,
    } else {
    }
    %c128_i32 = arith.constant 128 : i32
    %3 = arith.muli %arg1, %c128_i32 : i32
    %4 = tpu.assume_multiple %3, 128 : i32
    %c0 = arith.constant 0 : index
    %5 = arith.index_cast %4 : i32 to index
    %c0_1 = arith.constant 0 : index
    %6 = vector.load %arg2[%c0, %5, %c0_1] : memref<1x128x32xf32, #tpu.memory_space<vmem>>, vector<1x128x32xf32>
    %7 = vector.shape_cast %6 : vector<1x128x32xf32> to vector<128x32xf32>
    %c0_2 = arith.constant 0 : index
    %c0_3 = arith.constant 0 : index
    %8 = vector.load %arg3[%c0_2, %c0_3] : memref<32x32xf32, #tpu.memory_space<vmem>>, vector<32x32xf32>
    %cst = arith.constant dense<0.000000e+00> : vector<128x32xf32>
    %9 = tpu.matmul %7, %8, %cst {dimension_numbers = #tpu.dot_dimension_numbers<[1], [0], [0], [1], [0, 0, 1, 1], [], []>} : vector<128x32xf32>, vector<32x32xf32>, vector<128x32xf32> -> vector<128x32xf32>
    %c0_4 = arith.constant 0 : index
    %c0_5 = arith.constant 0 : index
    %10 = vector.load %arg4[%c0_4, %c0_5] : memref<1x32xf32, #tpu.memory_space<vmem>>, vector<1x32xf32>
    %11 = vector.broadcast %10 : vector<1x32xf32> to vector<128x32xf32>
    %12 = arith.addf %9, %11 : vector<128x32xf32>
    %c0_6 = arith.constant 0 : index
    %c0_7 = arith.constant 0 : index
    %13 = vector.load %arg9[%c0_6, %c0_7] : memref<128x32xf32, #tpu.memory_space<vmem>>, vector<128x32xf32>
    %cst_8 = arith.constant dense<0.000000e+00> : vector<128x128xf32>
    %14 = tpu.matmul %12, %13, %cst_8 {dimension_numbers = #tpu.dot_dimension_numbers<[1], [1], [0], [0], [0, 0, 1, 0], [], []>} : vector<128x32xf32>, vector<128x32xf32>, vector<128x128xf32> -> vector<128x128xf32>
    %c0_9 = arith.constant 0 : index
    %c0_10 = arith.constant 0 : index
    %c0_11 = arith.constant 0 : index
    %15 = vector.load %arg7[%c0_9, %c0_10, %c0_11] : memref<1x1x128xf32, #tpu.memory_space<vmem>>, vector<1x1x128xf32>
    %16 = vector.shape_cast %15 : vector<1x1x128xf32> to vector<1x128xf32>
    %17 = vector.broadcast %16 : vector<1x128xf32> to vector<128x128xf32>
    %18 = arith.addf %14, %17 : vector<128x128xf32>
    %c0_12 = arith.constant 0 : index
    %c0_13 = arith.constant 0 : index
    %c0_14 = arith.constant 0 : index
    %19 = vector.load %arg8[%c0_12, %c0_13, %c0_14] : memref<1x128x128xf32, #tpu.memory_space<vmem>>, vector<1x128x128xf32>
    %20 = vector.shape_cast %19 : vector<1x128x128xf32> to vector<128x128xf32>
    %21 = vector.shape_cast %18 : vector<128x128xf32> to vector<1x128x128xf32>
    tpu.vector_store %arg8[%c0_12, %c0_13, %c0_14], %21 {strides = array<i32>} : memref<1x128x128xf32, #tpu.memory_space<vmem>>, vector<1x128x128xf32>,
    return
  }
  func.func @transform_0(%arg0: i32, %arg1: i32) -> (i32, i32, i32) {
    %c0_i32 = arith.constant 0 : i32
    %c0_i32_0 = arith.constant 0 : i32
    %c0_i32_1 = arith.constant 0 : i32
    return %arg0, %c0_i32, %c0_i32_0 : i32, i32, i32
  }
  func.func @transform_1(%arg0: i32, %arg1: i32) -> (i32, i32) {
    %c0_i32 = arith.constant 0 : i32
    %c0_i32_0 = arith.constant 0 : i32
    %c0_i32_1 = arith.constant 0 : i32
    return %c0_i32, %c0_i32_0 : i32, i32
  }
  func.func @transform_2(%arg0: i32, %arg1: i32) -> (i32, i32) {
    %c0_i32 = arith.constant 0 : i32
    %c0_i32_0 = arith.constant 0 : i32
    %c0_i32_1 = arith.constant 0 : i32
    return %c0_i32, %c0_i32_0 : i32, i32
  }
  func.func @transform_3(%arg0: i32, %arg1: i32) -> (i32, i32) {
    %c0_i32 = arith.constant 0 : i32
    %c0_i32_0 = arith.constant 0 : i32
    %c0_i32_1 = arith.constant 0 : i32
    return %c0_i32, %c0_i32_0 : i32, i32
  }
  func.func @transform_4(%arg0: i32, %arg1: i32) -> (i32, i32) {
    %c0_i32 = arith.constant 0 : i32
    %c0_i32_0 = arith.constant 0 : i32
    %c0_i32_1 = arith.constant 0 : i32
    return %c0_i32, %c0_i32_0 : i32, i32
  }
  func.func @transform_5(%arg0: i32, %arg1: i32) -> (i32, i32, i32) {
    %c0_i32 = arith.constant 0 : i32
    %c0_i32_0 = arith.constant 0 : i32
    %c0_i32_1 = arith.constant 0 : i32
    return %arg0, %c0_i32, %c0_i32_0 : i32, i32, i32
  }
  func.func @transform_6(%arg0: i32, %arg1: i32) -> (i32, i32, i32) {
    %c0_i32 = arith.constant 0 : i32
    %c0_i32_0 = arith.constant 0 : i32
    return %arg0, %arg1, %c0_i32 : i32, i32, i32
  }
}

</mosaic_0001>

<bundles_post_ra>
// kernel: tpu_custom_call.1
= control target key start
LH: loop header
LB: loop body
LE: loop exit
PB: predicated region body
PF: predicated region fallthrough
CT: control target
= control target key end

     0   :  { %11 = vsyncpa [#allocation4], 0  ;;  %s1466_s0 = inlined_call_operand.vmem [shape: f32[2,128,32], index: 0, kind: input, shape index: {}]   ;;  %s1467_s1 = inlined_call_operand.vmem [shape: f32[32,32], index: 1, kind: input, shape index: {}]   ;;  %s1468_s2 = inlined_call_operand.vmem [shape: f32[1,32], index: 2, kind: input, shape index: {}]   ;;  %s1469_s3 = inlined_call_operand.vmem [shape: f32[32,32], index: 3, kind: input, shape index: {}]   ;;  %s1470_s4 = inlined_call_operand.vmem [shape: f32[1,32], index: 4, kind: input, shape index: {}]   ;;  %s1471_s5 = inlined_call_operand.vmem [shape: f32[2,1,128], index: 5, kind: input, shape index: {}]   ;;  %s1472_s6 = inlined_call_operand.hbm [shape: f32[2,128,128], index: 6, kind: output, shape index: {}]  }
   0x1   :  { %13 = vsyncpa [#allocation4 + $0x1], 0  ;;  %s1148_s21 = smov 0   ;;  %s1150_s22 = smov 0  }
   0x2   :  { %s1152_s23 = smov 0   ;;  %s1154_s24 = smov 0  }
   0x3   :  { %s1156_s25 = smov 0   ;;  %s1158_s26 = smov 0  }
   0x4 LB: > { %s876_s27 = sadd.s32 4294967295, %s1109_s26   ;;  %s877_s28 = sadd.s32 4294967294, %s1109_s26   ;;  %s1109_s26 = sphi %s1158_s26, %s19_s26   ;;  %s1105_s25 = sphi %s1156_s25, %s1479_s25   ;;  %s1101_s24 = sphi %s1154_s24, %s1478_s24   ;;  %s1097_s23 = sphi %s1152_s23, %s1477_s23   ;;  %s1093_s22 = sphi %s1150_s22, %s1476_s22   ;;  %s1089_s21 = sphi %s1148_s21, %s1475_s21  }
   0x5   : > { %s31_s29 = sadd.s32 1, %s1105_s25  ;;  %s176_s30 = sadd.s32 1, %s1097_s23 }
   0x6   : > { %p33_p0 = scmp.ge.s32.totalorder %s31_s29, 2  ;;  %p186_p1 = scmp.ne.s32.totalorder %s1097_s23, %s1093_s22 }
   0x7   : > { %p187_p2 = scmp.eq.s32.totalorder %s876_s27, 1  ;;  %p192_p3 = scmp.ne.s32.totalorder %s1093_s22, %s1089_s21 }
   0x8   : > { %s1481_s29 = smov (%p33_p0, %s31_s29), 0  ;;  %p193_p5 = scmp.eq.s32.totalorder %s877_s28, 1 }
   0x9   : > { %p1188_p4 = por %p187_p2, %p186_p1  ;;  %s171_s8 = ssub.s32 %s1105_s25, %s1481_s29 }
   0xa   : > { %p880_p6 = scmp.ge.s32.totalorder %s1109_s26, 1  ;;  %p174_p7 = scmp.eq.s32.totalorder %s171_s8, 0 }
   0xb   : > { %p1195_p8 = por %p193_p5, %p192_p3  ;;  %p237_p9 = scmp.lt.s32.totalorder %s1109_s26, 3 }
   0xc   : > { %s1201_s10 = scalar_select %p174_p7, %s1097_s23, %s176_s30  }
   0xd   : > { %p238_p10 = pnand %p880_p6, %p237_p9 }
   0xe   : > { %p270_p11 = scmp.lt.s32.totalorder (!%p238_p10), %s1101_s24, 1  ;;  %s267_s12 = sand.u32 (!%p238_p10), 1, %s1093_s22  }
   0xf   : > { %241 = sbr.rel (%p238_p10) target bundleno = 549 (0x225), region = 44  ;;  %s881_s13 = sshll.u32 (!%p238_p10), %s267_s12, 7 }
  0x10   : > { %s1409_s16 = scalar_lea.vmem (!%p238_p10), [#allocation3], %s881_s13  ;;  %s1051_s14 = scalar_lea.hbm (!%p238_p10), %s1472_s6, 256 }
  0x11   : > { %s789_s27 = sshll.u32 (!%p238_p10), %s1409_s16, 4  ;;  %s790_s27 = int_to_ptr.vmem [resolvable:$true] %s789_s27 }
  0x14   : > { %v302_v0 = vld [vmem:[%s1469_s3 + $0x18] sm:$0xff]  ;;  %v301_v1 = vld [vmem:[%s1469_s3 + $0x10] sm:$0xff]  ;;  %v300_v2 = vld [vmem:[%s1469_s3 + $0x8] sm:$0xff]  ;;  %s1214_s17 = scalar_select %p270_p11, %s1101_s24, 1  ;;  %vm307_vm0 = vcmask 261120  }
  0x15   : > { %368 = vmatpush.msra.mxu0 %v302_v0  ;;  %v299_v3 = vld [vmem:[%s1469_s3] sm:$0xff]  ;;  %v458_v17 = vld [vmem:[%s1467_s1 + $0x18] sm:$0xff]  ;;  %v457_v18 = vld [vmem:[%s1467_s1 + $0x10] sm:$0xff] }
  0x16   : > { %s953_s20 = sshll.u32 %s1214_s17, 7  ;;  %524 = vmatpush.msra.mxu1 %v458_v17  ;;  %v456_v19 = vld [vmem:[%s1467_s1 + $0x8] sm:$0xff]  ;;  %v455_v21 = vld [vmem:[%s1467_s1] sm:$0xff] }
  0x17   : > { %369 = vmatpush.msra.mxu0 %v301_v1  ;;  %s1223_s30 = scalar_lea.vmem %s1466_s0, %s953_s20  ;;  %v1275_v24 = vld [vmem:[%s1470_s4] ss:$0 sm:$0xff] }
  0x18   : > { %v283_v4 = vld [vmem:[%s1223_s30] sm:$0xff]  ;;  %v284_v5 = vld [vmem:[%s1223_s30 + $0x8] sm:$0xff]  ;;  %v285_v6 = vld [vmem:[%s1223_s30 + $0x10] sm:$0xff]  ;;  %525 = vmatpush.msra.mxu1 %v457_v18 }
  0x19   : > { %370 = vmatpush.msra.mxu0 %v300_v2  ;;  %v286_v7 = vld [vmem:[%s1223_s30 + $0x18] sm:$0xff]  ;;  %v287_v8 = vld [vmem:[%s1223_s30 + $0x20] sm:$0xff]  ;;  %v288_v9 = vld [vmem:[%s1223_s30 + $0x28] sm:$0xff] }
  0x1a   : > { %v289_v10 = vld [vmem:[%s1223_s30 + $0x30] sm:$0xff]  ;;  %v290_v11 = vld [vmem:[%s1223_s30 + $0x38] sm:$0xff]  ;;  %v291_v12 = vld [vmem:[%s1223_s30 + $0x40] sm:$0xff]  ;;  %526 = vmatpush.msra.mxu1 %v456_v19 }
  0x1b   : > { %371 = vmatpush.msra.mxu0 %v299_v3  ;;  %v292_v13 = vld [vmem:[%s1223_s30 + $0x48] sm:$0xff]  ;;  %v293_v14 = vld [vmem:[%s1223_s30 + $0x50] sm:$0xff]  ;;  %v294_v15 = vld [vmem:[%s1223_s30 + $0x58] sm:$0xff] }
  0x1c   : > { %884 = vmatmul.msk.f32.vlgmr.msra.gmra.mxu0 %vm307_vm0, %v283_v4  ;;  %v295_v16 = vld [vmem:[%s1223_s30 + $0x60] sm:$0xff]  ;;  %v296_v20 = vld [vmem:[%s1223_s30 + $0x68] sm:$0xff]  ;;  %527 = vmatpush.msra.mxu1 %v455_v21  ;;  %v297_v22 = vld [vmem:[%s1223_s30 + $0x70] sm:$0xff] }
  0x1d   : > { %900 = vmatmul.msk.f32.vlgmr.msra.gmra.mxu1 %vm307_vm0, %v283_v4  ;;  %v298_v23 = vld [vmem:[%s1223_s30 + $0x78] sm:$0xff]  ;;  %s277_s30 = scalar_lea.vmem %s1471_s5, %s1214_s17  ;;  %s954_s17 = sshll.u32 %s1101_s24, 7 }
  0x1e   : > { %s788_s20 = scalar_lea.hbm %s1472_s6, %s954_s17 }
  0x1f   : > { %s791_s28 = sshll.u32 %s788_s20, 4  ;;  %s792_s28 = int_to_ptr.hbm [resolvable:$true] %s791_s28 }
  0x20   : > { %s1045_s8 = sshra.s32 %s792_s28, 4  ;;  %s1046_s8 = int_to_ptr.hbm [resolvable:$true] %s1045_s8 }
  0x21   : > { %s1047_s24 = scalar_lea.hbm %s1046_s8, 128  ;;  %p1052_p1 = scmp.lt.s32.totalorder %s1046_s8, %s1472_s6 }
  0x22   : > { %p1048_p12 = scmp.ne.s32.totalorder %s1046_s8, %s1047_s24  ;;  %p1053_p2 = scmp.lt.s32.totalorder %s1051_s14, %s1047_s24 }
  0x24   : > { %885 = vmatmul.msk.f32.gmra.mxu0 %vm307_vm0, %v284_v5  ;;  %p1049_p13 = pnand %p1048_p12, %p1188_p4  ;;  %p1054_p3 = por %p1053_p2, %p1052_p1 }
  0x25   : > { %901 = vmatmul.msk.f32.gmra.mxu1 %vm307_vm0, %v284_v5 }
  0x26   : > { %p1050_p0 = pneg %p1049_p13 }
  0x28   : > { %p1055_p5 = pnand %p1054_p3, %p1050_p0 }
  0x2c   : > { %886 = vmatmul.msk.f32.gmra.mxu0 %vm307_vm0, %v285_v6 }
  0x2d   : > { %902 = vmatmul.msk.f32.gmra.mxu1 %vm307_vm0, %v285_v6 }
  0x34   : > { %887 = vmatmul.msk.f32.gmra.mxu0 %vm307_vm0, %v286_v7 }
  0x35   : > { %903 = vmatmul.msk.f32.gmra.mxu1 %vm307_vm0, %v286_v7 }
  0x3c   : > { %888 = vmatmul.msk.f32.gmra.mxu0 %vm307_vm0, %v287_v8 }
  0x3d   : > { %904 = vmatmul.msk.f32.gmra.mxu1 %vm307_vm0, %v287_v8 }
  0x44   : > { %889 = vmatmul.msk.f32.gmra.mxu0 %vm307_vm0, %v288_v9 }
  0x45   : > { %905 = vmatmul.msk.f32.gmra.mxu1 %vm307_vm0, %v288_v9 }
  0x4c   : > { %890 = vmatmul.msk.f32.gmra.mxu0 %vm307_vm0, %v289_v10 }
  0x4d   : > { %906 = vmatmul.msk.f32.gmra.mxu1 %vm307_vm0, %v289_v10  ;;  %v1029_v10 = vld [vmem:[%s1468_s2] ss:$0 sm:$0xff] }
  0x54   : > { %891 = vmatmul.msk.f32.gmra.mxu0 %vm307_vm0, %v290_v11 }
  0x55   : > { %907 = vmatmul.msk.f32.gmra.mxu1 %vm307_vm0, %v290_v11 }
  0x5c   : > { %892 = vmatmul.msk.f32.gmra.mxu0 %vm307_vm0, %v291_v12 }
  0x5d   : > { %908 = vmatmul.msk.f32.gmra.mxu1 %vm307_vm0, %v291_v12 }
  0x64   : > { %893 = vmatmul.msk.f32.gmra.mxu0 %vm307_vm0, %v292_v13 }
  0x65   : > { %909 = vmatmul.msk.f32.gmra.mxu1 %vm307_vm0, %v292_v13 }
  0x6c   : > { %894 = vmatmul.msk.f32.gmra.mxu0 %vm307_vm0, %v293_v14 }
  0x6d   : > { %910 = vmatmul.msk.f32.gmra.mxu1 %vm307_vm0, %v293_v14 }
  0x74   : > { %895 = vmatmul.msk.f32.gmra.mxu0 %vm307_vm0, %v294_v15 }
  0x75   : > { %911 = vmatmul.msk.f32.gmra.mxu1 %vm307_vm0, %v294_v15 }
  0x7c   : > { %896 = vmatmul.msk.f32.gmra.mxu0 %vm307_vm0, %v295_v16 }
  0x7d   : > { %912 = vmatmul.msk.f32.gmra.mxu1 %vm307_vm0, %v295_v16 }
  0x84   : > { %897 = vmatmul.msk.f32.gmra.mxu0 %vm307_vm0, %v296_v20 }
  0x85   : > { %913 = vmatmul.msk.f32.gmra.mxu1 %vm307_vm0, %v296_v20 }
  0x8c   : > { %898 = vmatmul.msk.f32.gmra.mxu0 %vm307_vm0, %v297_v22 }
  0x8d   : > { %914 = vmatmul.msk.f32.gmra.mxu1 %vm307_vm0, %v297_v22 }
  0x94   : > { %899 = vmatmul.msk.f32.gmra.mxu0 %vm307_vm0, %v298_v23 }
  0x95   : > { %915 = vmatmul.msk.f32.gmra.mxu1 %vm307_vm0, %v298_v23 }
  0x99   : > { %v373_v25 = vpop.f32.mrf.mxu0 }
  0x9a   : > { %v374_v26 = vadd.f32 %v1275_v24, %v373_v25  ;;  %v1316_v51 = vpop.f32.mrf.mxu1 }
  0x9b   : > { %v530_v23 = vadd.f32 %v1029_v10, %v1316_v51 }
  0x9c   : > { %421 = vst.msk [vmem:[#allocation2] sm:$0xff] %vm307_vm0, %v374_v26 }
  0xa1   : > { %v376_v27 = vpop.f32.mrf.mxu0 }
  0xa2   : > { %v377_v28 = vadd.f32 %v1275_v24, %v376_v27  ;;  %v1320_v54 = vpop.f32.mrf.mxu1 }
  0xa3   : > { %v577_v21 = vld [vmem:[#allocation2] sm:$0xff]  ;;  %v533_v26 = vadd.f32 %v1029_v10, %v1320_v54 }
  0xa4   : > { %422 = vst.msk [vmem:[#allocation2 + $0x8] sm:$0xff] %vm307_vm0, %v377_v28 }
  0xa9   : > { %v379_v29 = vpop.f32.mrf.mxu0 }
  0xaa   : > { %v380_v30 = vadd.f32 %v1275_v24, %v379_v29  ;;  %v1324_v57 = vpop.f32.mrf.mxu1 }
  0xab   : > { %v578_v20 = vld [vmem:[#allocation2 + $0x8] sm:$0xff]  ;;  %v536_v29 = vadd.f32 %v1029_v10, %v1324_v57 }
  0xac   : > { %423 = vst.msk [vmem:[#allocation2 + $0x10] sm:$0xff] %vm307_vm0, %v380_v30 }
  0xb1   : > { %v382_v31 = vpop.f32.mrf.mxu0 }
  0xb2   : > { %v383_v32 = vadd.f32 %v1275_v24, %v382_v31  ;;  %v1328_v60 = vpop.f32.mrf.mxu1 }
  0xb3   : > { %v579_v18 = vld [vmem:[#allocation2 + $0x10] sm:$0xff] }
  0xb4   : > { %424 = vst.msk [vmem:[#allocation2 + $0x18] sm:$0xff] %vm307_vm0, %v383_v32  ;;  %v539_v32 = vadd.f32 %v1029_v10, %v1328_v60 }
  0xb9   : > { %v385_v33 = vpop.f32.mrf.mxu0 }
  0xba   : > { %v386_v34 = vadd.f32 %v1275_v24, %v385_v33  ;;  %v1338_v63 = vpop.f32.mrf.mxu1 }
  0xbb   : > { %v580_v17 = vld [vmem:[#allocation2 + $0x18] sm:$0xff] }
  0xbc   : > { %425 = vst.msk [vmem:[#allocation2 + $0x20] sm:$0xff] %vm307_vm0, %v386_v34  ;;  %v542_v34 = vadd.f32 %v1029_v10, %v1338_v63 }
  0xc1   : > { %v388_v35 = vpop.f32.mrf.mxu0 }
  0xc2   : > { %v389_v36 = vadd.f32 %v1275_v24, %v388_v35  ;;  %v1344_v2 = vpop.f32.mrf.mxu1 }
  0xc3   : > { %v581_v15 = vld [vmem:[#allocation2 + $0x20] sm:$0xff] }
  0xc4   : > { %426 = vst.msk [vmem:[#allocation2 + $0x28] sm:$0xff] %vm307_vm0, %v389_v36 }
  0xc9   : > { %v391_v37 = vpop.f32.mrf.mxu0 }
  0xca   : > { %v392_v38 = vadd.f32 %v1275_v24, %v391_v37  ;;  %v1350_v5 = vpop.f32.mrf.mxu1  ;;  %v545_v37 = vadd.f32 %v1029_v10, %v1344_v2 }
  0xcb   : > { %v582_v14 = vld [vmem:[#allocation2 + $0x28] sm:$0xff] }
  0xcc   : > { %427 = vst.msk [vmem:[#allocation2 + $0x30] sm:$0xff] %vm307_vm0, %v392_v38 }
  0xd1   : > { %v394_v39 = vpop.f32.mrf.mxu0 }
  0xd2   : > { %v395_v40 = vadd.f32 %v1275_v24, %v394_v39  ;;  %v1356_v8 = vpop.f32.mrf.mxu1 }
  0xd3   : > { %v583_v11 = vld [vmem:[#allocation2 + $0x30] sm:$0xff] }
  0xd4   : > { %428 = vst.msk [vmem:[#allocation2 + $0x38] sm:$0xff] %vm307_vm0, %v395_v40  ;;  %v548_v40 = vadd.f32 %v1029_v10, %v1350_v5 }
  0xd9   : > { %v397_v41 = vpop.f32.mrf.mxu0 }
  0xda   : > { %v398_v42 = vadd.f32 %v1275_v24, %v397_v41  ;;  %v553_v12 = vpop.f32.mrf.mxu1  ;;  %v551_v41 = vadd.f32 %v1029_v10, %v1356_v8 }
  0xdb   : > { %v584_v9 = vld [vmem:[#allocation2 + $0x38] sm:$0xff]  ;;  %v554_v13 = vadd.f32 %v1029_v10, %v553_v12 }
  0xdc   : > { %429 = vst.msk [vmem:[#allocation2 + $0x40] sm:$0xff] %vm307_vm0, %v398_v42  ;;  %v1030_v42 = vld [vmem:[%s277_s30] ss:$0 sm:$0xff]  ;;  %s775_s30 = scalar_lea.sflag [#allocation4], %s267_s12 }
  0xe1   : > { %v400_v43 = vpop.f32.mrf.mxu0 }
  0xe2   : > { %v401_v44 = vadd.f32 %v1275_v24, %v400_v43  ;;  %v556_v16 = vpop.f32.mrf.mxu1 }
  0xe3   : > { %v585_v7 = vld [vmem:[#allocation2 + $0x40] sm:$0xff]  ;;  %v557_v22 = vadd.f32 %v1029_v10, %v556_v16 }
  0xe4   : > { %430 = vst.msk [vmem:[#allocation2 + $0x48] sm:$0xff] %vm307_vm0, %v401_v44 }
  0xe9   : > { %v403_v45 = vpop.f32.mrf.mxu0 }
  0xea   : > { %v404_v46 = vadd.f32 %v1275_v24, %v403_v45  ;;  %v559_v19 = vpop.f32.mrf.mxu1 }
  0xeb   : > { %v586_v6 = vld [vmem:[#allocation2 + $0x48] sm:$0xff]  ;;  %v560_v25 = vadd.f32 %v1029_v10, %v559_v19 }
  0xec   : > { %431 = vst.msk [vmem:[#allocation2 + $0x50] sm:$0xff] %vm307_vm0, %v404_v46 }
  0xf1   : > { %v406_v47 = vpop.f32.mrf.mxu0 }
  0xf2   : > { %v407_v48 = vadd.f32 %v1275_v24, %v406_v47 }
  0xf3   : > { %v587_v4 = vld [vmem:[#allocation2 + $0x50] sm:$0xff] }
  0xf4   : > { %432 = vst.msk [vmem:[#allocation2 + $0x58] sm:$0xff] %vm307_vm0, %v407_v48 }
  0xf9   : > { %v409_v49 = vpop.f32.mrf.mxu0 }
  0xfa   : > { %v410_v50 = vadd.f32 %v1275_v24, %v409_v49 }
  0xfb   : > { %v588_v3 = vld [vmem:[#allocation2 + $0x58] sm:$0xff] }
  0xfc   : > { %433 = vst.msk [vmem:[#allocation2 + $0x60] sm:$0xff] %vm307_vm0, %v410_v50 }
 0x101   : > { %v412_v52 = vpop.f32.mrf.mxu0 }
 0x102   : > { %v413_v53 = vadd.f32 %v1275_v24, %v412_v52 }
 0x103   : > { %v589_v1 = vld [vmem:[#allocation2 + $0x60] sm:$0xff] }
 0x104   : > { %434 = vst.msk [vmem:[#allocation2 + $0x68] sm:$0xff] %vm307_vm0, %v413_v53 }
 0x109   : > { %v415_v55 = vpop.f32.mrf.mxu0 }
 0x10a   : > { %v416_v56 = vadd.f32 %v1275_v24, %v415_v55 }
 0x10b   : > { %v590_v0 = vld [vmem:[#allocation2 + $0x68] sm:$0xff] }
 0x10c   : > { %435 = vst.msk [vmem:[#allocation2 + $0x70] sm:$0xff] %vm307_vm0, %v416_v56 }
 0x111   : > { %v418_v58 = vpop.f32.mrf.mxu0 }
 0x112   : > { %v419_v59 = vadd.f32 %v1275_v24, %v418_v58  ;;  %v562_v24 = vpop.f32.mrf.mxu1 }
 0x113   : > { %v591_v62 = vld [vmem:[#allocation2 + $0x70] sm:$0xff]  ;;  %v563_v28 = vadd.f32 %v1029_v10, %v562_v24 }
 0x114   : > { %436 = vst.msk [vmem:[#allocation2 + $0x78] sm:$0xff] %vm307_vm0, %v419_v59 }
 0x11a   : > { %v565_v27 = vpop.f32.mrf.mxu1 }
 0x11b   : > { %v592_v61 = vld [vmem:[#allocation2 + $0x78] sm:$0xff]  ;;  %v566_v30 = vadd.f32 %v1029_v10, %v565_v27 }
 0x11c   : > { %916 = vmatpush.xpose.msk.msra.mxu2 %vm307_vm0, %v592_v61  ;;  %955 = vmatpush.xpose.msk.msra.mxu3 %vm307_vm0, %v592_v61 }
 0x120   : > { %917 = vmatpush.xpose.msk.msra.mxu2 %vm307_vm0, %v591_v62  ;;  %956 = vmatpush.xpose.msk.msra.mxu3 %vm307_vm0, %v591_v62 }
 0x122   : > { %v568_v31 = vpop.f32.mrf.mxu1 }
 0x123   : > { %v569_v33 = vadd.f32 %v1029_v10, %v568_v31 }
 0x124   : > { %918 = vmatpush.xpose.msk.msra.mxu2 %vm307_vm0, %v590_v0  ;;  %957 = vmatpush.xpose.msk.msra.mxu3 %vm307_vm0, %v590_v0 }
 0x128   : > { %919 = vmatpush.xpose.msk.msra.mxu2 %vm307_vm0, %v589_v1  ;;  %958 = vmatpush.xpose.msk.msra.mxu3 %vm307_vm0, %v589_v1 }
 0x12a   : > { %v571_v35 = vpop.f32.mrf.mxu1 }
 0x12b   : > { %v572_v36 = vadd.f32 %v1029_v10, %v571_v35 }
 0x12c   : > { %920 = vmatpush.xpose.msk.msra.mxu2 %vm307_vm0, %v588_v3  ;;  %959 = vmatpush.xpose.msk.msra.mxu3 %vm307_vm0, %v588_v3 }
 0x130   : > { %921 = vmatpush.xpose.msk.msra.mxu2 %vm307_vm0, %v587_v4  ;;  %960 = vmatpush.xpose.msk.msra.mxu3 %vm307_vm0, %v587_v4 }
 0x132   : > { %v574_v38 = vpop.f32.mrf.mxu1 }
 0x133   : > { %v575_v39 = vadd.f32 %v1029_v10, %v574_v38 }
 0x134   : > { %922 = vmatpush.xpose.msk.msra.mxu2 %vm307_vm0, %v586_v6  ;;  %961 = vmatpush.xpose.msk.msra.mxu3 %vm307_vm0, %v586_v6 }
 0x138   : > { %923 = vmatpush.xpose.msk.msra.mxu2 %vm307_vm0, %v585_v7  ;;  %962 = vmatpush.xpose.msk.msra.mxu3 %vm307_vm0, %v585_v7 }
 0x13c   : > { %924 = vmatpush.xpose.msk.msra.mxu2 %vm307_vm0, %v584_v9  ;;  %963 = vmatpush.xpose.msk.msra.mxu3 %vm307_vm0, %v584_v9 }
 0x140   : > { %925 = vmatpush.xpose.msk.msra.mxu2 %vm307_vm0, %v583_v11  ;;  %964 = vmatpush.xpose.msk.msra.mxu3 %vm307_vm0, %v583_v11 }
 0x144   : > { %926 = vmatpush.xpose.msk.msra.mxu2 %vm307_vm0, %v582_v14  ;;  %965 = vmatpush.xpose.msk.msra.mxu3 %vm307_vm0, %v582_v14 }
 0x148   : > { %927 = vmatpush.xpose.msk.msra.mxu2 %vm307_vm0, %v581_v15  ;;  %966 = vmatpush.xpose.msk.msra.mxu3 %vm307_vm0, %v581_v15 }
 0x14c   : > { %928 = vmatpush.xpose.msk.msra.mxu2 %vm307_vm0, %v580_v17  ;;  %967 = vmatpush.xpose.msk.msra.mxu3 %vm307_vm0, %v580_v17 }
 0x150   : > { %929 = vmatpush.xpose.msk.msra.mxu2 %vm307_vm0, %v579_v18  ;;  %968 = vmatpush.xpose.msk.msra.mxu3 %vm307_vm0, %v579_v18 }
 0x154   : > { %930 = vmatpush.xpose.msk.msra.mxu2 %vm307_vm0, %v578_v20  ;;  %969 = vmatpush.xpose.msk.msra.mxu3 %vm307_vm0, %v578_v20 }
 0x158   : > { %931 = vmatpush.xpose.msk.msra.mxu2 %vm307_vm0, %v577_v21  ;;  %970 = vmatpush.xpose.msk.msra.mxu3 %vm307_vm0, %v577_v21 }
 0x15b   : > { %932 = vmatmul.msk.f32.vlgmr.msra.gmra.mxu2 %vm307_vm0, %v530_v23  ;;  %941 = vmatmul.msk.f32.vlgmr.msra.gmra.mxu3 %vm307_vm0, %v557_v22 }
 0x163   : > { %933 = vmatmul.msk.f32.gmra.mxu2 %vm307_vm0, %v533_v26  ;;  %942 = vmatmul.msk.f32.gmra.mxu3 %vm307_vm0, %v560_v25 }
 0x16b   : > { %934 = vmatmul.msk.f32.gmra.mxu2 %vm307_vm0, %v536_v29  ;;  %943 = vmatmul.msk.f32.gmra.mxu3 %vm307_vm0, %v563_v28 }
 0x173   : > { %935 = vmatmul.msk.f32.gmra.mxu2 %vm307_vm0, %v539_v32  ;;  %944 = vmatmul.msk.f32.gmra.mxu3 %vm307_vm0, %v566_v30 }
 0x17b   : > { %936 = vmatmul.msk.f32.gmra.mxu2 %vm307_vm0, %v542_v34  ;;  %945 = vmatmul.msk.f32.gmra.mxu3 %vm307_vm0, %v569_v33 }
 0x183   : > { %937 = vmatmul.msk.f32.gmra.mxu2 %vm307_vm0, %v545_v37  ;;  %946 = vmatmul.msk.f32.gmra.mxu3 %vm307_vm0, %v572_v36 }
 0x18b   : > { %938 = vmatmul.msk.f32.gmra.mxu2 %vm307_vm0, %v548_v40  ;;  %947 = vmatmul.msk.f32.gmra.mxu3 %vm307_vm0, %v575_v39 }
 0x193   : > { %939 = vmatmul.msk.f32.gmra.mxu2 %vm307_vm0, %v551_v41 }
 0x19b   : > { %940 = vmatmul.msk.f32.gmra.mxu2 %vm307_vm0, %v554_v13 }
 0x1de   : > { %v710_v43 = vpop.f32.mrf.mxu2  ;;  %v737_v44 = vpop.f32.mrf.mxu3 }
 0x1df   : > { %v711_v45 = vadd.f32 %v1030_v42, %v710_v43  ;;  %v738_v46 = vadd.f32 %v1030_v42, %v737_v44 }
 0x1e1   : > { %758 = vst [vmem:[%s1409_s16] sm:$0xff] %v711_v45 }
 0x1e2   : > { %767 = vst [vmem:[%s1409_s16 + $0x48] sm:$0xff] %v738_v46 }
 0x1e6   : > { %v713_v47 = vpop.f32.mrf.mxu2  ;;  %v740_v48 = vpop.f32.mrf.mxu3 }
 0x1e7   : > { %v714_v49 = vadd.f32 %v1030_v42, %v713_v47  ;;  %v741_v50 = vadd.f32 %v1030_v42, %v740_v48 }
 0x1e9   : > { %759 = vst [vmem:[%s1409_s16 + $0x8] sm:$0xff] %v714_v49 }
 0x1ea   : > { %768 = vst [vmem:[%s1409_s16 + $0x50] sm:$0xff] %v741_v50 }
 0x1ee   : > { %v716_v51 = vpop.f32.mrf.mxu2  ;;  %v743_v52 = vpop.f32.mrf.mxu3 }
 0x1ef   : > { %v717_v53 = vadd.f32 %v1030_v42, %v716_v51  ;;  %v744_v54 = vadd.f32 %v1030_v42, %v743_v52 }
 0x1f1   : > { %760 = vst [vmem:[%s1409_s16 + $0x10] sm:$0xff] %v717_v53 }
 0x1f2   : > { %769 = vst [vmem:[%s1409_s16 + $0x58] sm:$0xff] %v744_v54 }
 0x1f6   : > { %v719_v55 = vpop.f32.mrf.mxu2  ;;  %v746_v56 = vpop.f32.mrf.mxu3 }
 0x1f7   : > { %v720_v57 = vadd.f32 %v1030_v42, %v719_v55  ;;  %v747_v58 = vadd.f32 %v1030_v42, %v746_v56 }
 0x1f9   : > { %761 = vst [vmem:[%s1409_s16 + $0x18] sm:$0xff] %v720_v57 }
 0x1fa   : > { %770 = vst [vmem:[%s1409_s16 + $0x60] sm:$0xff] %v747_v58 }
 0x1fe   : > { %v722_v59 = vpop.f32.mrf.mxu2  ;;  %v749_v60 = vpop.f32.mrf.mxu3 }
 0x1ff   : > { %v723_v61 = vadd.f32 %v1030_v42, %v722_v59  ;;  %v750_v62 = vadd.f32 %v1030_v42, %v749_v60 }
 0x201   : > { %762 = vst [vmem:[%s1409_s16 + $0x20] sm:$0xff] %v723_v61 }
 0x202   : > { %771 = vst [vmem:[%s1409_s16 + $0x68] sm:$0xff] %v750_v62 }
 0x206   : > { %v725_v63 = vpop.f32.mrf.mxu2  ;;  %v752_v0 = vpop.f32.mrf.mxu3 }
 0x207   : > { %v726_v1 = vadd.f32 %v1030_v42, %v725_v63  ;;  %v753_v2 = vadd.f32 %v1030_v42, %v752_v0 }
 0x209   : > { %763 = vst [vmem:[%s1409_s16 + $0x28] sm:$0xff] %v726_v1 }
 0x20a   : > { %772 = vst [vmem:[%s1409_s16 + $0x70] sm:$0xff] %v753_v2 }
 0x20e   : > { %v728_v3 = vpop.f32.mrf.mxu2  ;;  %v755_v4 = vpop.f32.mrf.mxu3 }
 0x20f   : > { %v729_v5 = vadd.f32 %v1030_v42, %v728_v3  ;;  %v756_v6 = vadd.f32 %v1030_v42, %v755_v4 }
 0x211   : > { %764 = vst [vmem:[%s1409_s16 + $0x30] sm:$0xff] %v729_v5 }
 0x212   : > { %773 = vst [vmem:[%s1409_s16 + $0x78] sm:$0xff] %v756_v6 }
 0x216   : > { %v731_v7 = vpop.f32.mrf.mxu2 }
 0x217   : > { %v732_v8 = vadd.f32 %v1030_v42, %v731_v7 }
 0x219   : > { %765 = vst [vmem:[%s1409_s16 + $0x38] sm:$0xff] %v732_v8 }
 0x21e   : > { %v734_v9 = vpop.f32.mrf.mxu2 }
 0x21f   : > { %v735_v10 = vadd.f32 %v1030_v42, %v734_v9 }
 0x221   : > { %766 = vst [vmem:[%s1409_s16 + $0x40] sm:$0xff] %v735_v10 }
 0x222   : > { %1058 = shalt.err (!%p1055_p5)
}
 0x223   : > { %s1111_s12 = smov 128   ;;  %s1112_s16 = smov 8  }
 0x224   : > { %971 = dma.vmem_to_hbm [thread:$0]  (%p1188_p4), %s790_s27, 2048, %s792_s28, %s775_s30, %s1111_s12, %s1111_s12, %s1112_s16  }
 0x225 PF: > { %p977_p6 = scmp.ge.s32.totalorder %s1109_s26, 2  ;;  %s806_s18 = sand.u32 1, %s1089_s21  }
 0x226   : > { %s807_s19 = scalar_lea.sflag [#allocation4], %s806_s18 }
 0x227   : > { %p974_p7 = pnand %p977_p6, %p1195_p8 }
 0x229   : > { %p975_p9 = pneg %p974_p7 }
 0x22b   : > { %1084 = dma.done.wait (%p975_p9), %s807_s19, 2048  }
 0x22c   : > { %1086 = vsyncadd (%p975_p9), %s807_s19, 4294965248  ;;  %s19_s26 = sadd.s32 1, %s1109_s26   ;;  %s1475_s21 = smov %s1093_s22 }
 0x22d   : > { %p16_p10 = scmp.ge.s32.totalorder %s19_s26, 4   ;;  %s1476_s22 = smov %s1097_s23 }
 0x22e   : > { %s1477_s23 = smov %s1201_s10  ;;  %s1478_s24 = smov %s1105_s25 }
 0x22f   : > { %s1479_s25 = smov %s1481_s29  ;;  %18 = sbr.rel (!%p16_p10) target bundleno = 4 (0x4), region = 87 }
 0x234   :  { %813 = vsyncpa [#allocation4], 1 }
 0x235   :  { %815 = vsyncpa [#allocation4 + $0x1], 1 }

</bundles_post_ra>
